<compile_context>
chip_gen: v7x
topology: tpu7x:2x2x1
jax: 0.10.0
libtpu: 0.0.40
codegen_flags: <defaults>
</compile_context>

<pallas_src>
import jax
import jax.numpy as jnp
import numpy as np
from jax.experimental import pallas as pl
from jax.experimental.pallas import tpu as pltpu

N_CLASS = 4          # module's n_class in the test below
DECAY = 0.3          # self.decay
THRESHOLD = 0.9      # confidence threshold in forward()

_MAX_TILE_N = 2048                       # upper cap on batch rows per grid step
_VMEM_STREAM_BUDGET = 40 * 1024 * 1024   # double-buffered stream budget (v7x-safe)
_VMEM_LIMIT = 48 * 1024 * 1024           # < v7x 64 MiB physical; headroom on v5e/v6e
_NEG = -1e30         # class-pad logit value (never wins a max, no inf/NaN hazards)


def _round_up(x, m):
    return (x + m - 1) // m * m


def _pick_tile_n(n, d, feat_bytes, c_pad):
    """Rows per grid step: single full-extent tile if the batch fits, else the
    largest 128-multiple allowed by the double-buffered VMEM stream budget."""
    per_row = 2 * (2 * d * feat_bytes + 2 * c_pad * 4)   # 2 buffers x (2 feats + 2 logit cols)
    budget_rows = max(128, (_VMEM_STREAM_BUDGET // per_row) // 128 * 128)
    cap = min(_MAX_TILE_N, budget_rows)
    if n <= cap:
        return n          # one tile; block == full array extent along batch
    return cap            # multiple of 128 -> aligned logit lanes; ragged tail masked


def _make_kernel(n_actual, c_real, c_pad, d, tile_n):
    inv_cd = 1.0 / float(c_real * d)
    f32 = jnp.float32

    def accumulate(pid, y_ref, feat_ref, sum_ref, cnt_ref):
        y = y_ref[...]                                     # (c_pad, tile_n) f32
        # torch.max(y, 1): max value + first-occurrence argmax, batch on lanes.
        max_val = jnp.max(y, axis=0, keepdims=True)        # (1, tile_n)
        row = jax.lax.broadcasted_iota(jnp.int32, y.shape, 0)
        is_max = y == max_val
        first = jnp.min(jnp.where(is_max, row, c_pad), axis=0, keepdims=True)
        onehot = (row == first).astype(f32)                # (c_pad, tile_n)

        # Ragged final tile: out-of-range VMEM contents are unspecified (may be
        # NaN/Inf), so mask the logit columns AND zero the feature rows.
        col = jax.lax.broadcasted_iota(jnp.int32, (1, tile_n), 1)
        valid_col = (pid * tile_n + col) < n_actual        # (1, tile_n)
        onehot = jnp.where(valid_col, onehot, 0.0)
        rowi = jax.lax.broadcasted_iota(jnp.int32, (tile_n, 1), 0)
        valid_row = (pid * tile_n + rowi) < n_actual       # (tile_n, 1)
        feat = jnp.where(valid_row, feat_ref[...].astype(f32), 0.0)   # (tile_n, d)

        # Class counts: plain lane reduction, no MXU round-trip.
        cnt_ref[...] += jnp.sum(onehot, axis=1, keepdims=True)        # (c_pad, 1)
        # Thresholded logit weight folded into the one-hot (diagonal weighting);
        # the valid mask also kills garbage (Inf) logits in the ragged tail.
        w = jnp.where(jnp.logical_and(valid_col, max_val > THRESHOLD),
                      max_val, 0.0)                                    # (1, tile_n)
        sum_ref[...] += jnp.dot(onehot * w, feat,
                                preferred_element_type=f32)            # (c_pad, d)

    def kernel(s_feat_ref, t_feat_ref, y_s_ref, y_t_ref,
               s_cent_ref, t_cent_ref,
               loss_ref, new_s_ref, new_t_ref,
               s_sum, s_cnt, t_sum, t_cnt):
        pid = pl.program_id(0)

        @pl.when(pid == 0)
        def _():
            s_sum[...] = jnp.zeros_like(s_sum)
            t_sum[...] = jnp.zeros_like(t_sum)
            s_cnt[...] = jnp.zeros_like(s_cnt)
            t_cnt[...] = jnp.zeros_like(t_cnt)

        accumulate(pid, y_s_ref, s_feat_ref, s_sum, s_cnt)
        accumulate(pid, y_t_ref, t_feat_ref, t_sum, t_cnt)

        @pl.when(pid == pl.num_programs(0) - 1)
        def _():
            cur_s = s_sum[...] / jnp.maximum(s_cnt[...], 1.0)
            cur_t = t_sum[...] / jnp.maximum(t_cnt[...], 1.0)
            new_s = (1.0 - DECAY) * s_cent_ref[...] + DECAY * cur_s
            new_t = (1.0 - DECAY) * t_cent_ref[...] + DECAY * cur_t
            new_s_ref[...] = new_s
            new_t_ref[...] = new_t
            diff = new_s - new_t
            # Padded class rows are exactly zero in both centroids, so the sum
            # over the padded (c_pad, d) block equals the sum over (c, d).
            loss_ref[0, 0] = jnp.sum(diff * diff) * inv_cd   # nn.MSELoss (mean)

    return kernel


@jax.jit
def semantic_loss(s_feature, t_feature, y_s, y_t, s_centroid, t_centroid):
    """Returns (loss, new_s_centroid, new_t_centroid).  The torch module's
    self.s_centroid / self.t_centroid side effect is returned explicitly (JAX
    is functional); the kernel updates the centroid buffers in place via
    input_output_aliases."""
    n, d = s_feature.shape
    c = y_s.shape[1]
    f32 = jnp.float32

    c_pad = max(8, _round_up(c, 8))
    feat_bytes = jnp.dtype(s_feature.dtype).itemsize
    tile_n = _pick_tile_n(n, d, feat_bytes, c_pad)
    num_tiles = pl.cdiv(n, tile_n)

    # Tiny (C_pad, N) lane-dense logit relayout; only the class dim is padded
    # (value -1e30 so padding never wins the max).  The batch axis is NOT
    # padded: the ragged last tile is handled by in-kernel masks.  Features
    # stream untouched at their source dtype.
    y_s_t = jnp.pad(jnp.transpose(y_s).astype(f32), ((0, c_pad - c), (0, 0)),
                    constant_values=_NEG)
    y_t_t = jnp.pad(jnp.transpose(y_t).astype(f32), ((0, c_pad - c), (0, 0)),
                    constant_values=_NEG)
    s_cent = jnp.pad(s_centroid.astype(f32), ((0, c_pad - c), (0, 0)))
    t_cent = jnp.pad(t_centroid.astype(f32), ((0, c_pad - c), (0, 0)))

    kernel = _make_kernel(n, c, c_pad, d, tile_n)

    feat_spec = pl.BlockSpec((tile_n, d), lambda i: (i, 0))
    logit_spec = pl.BlockSpec((c_pad, tile_n), lambda i: (0, i))
    cent_spec = pl.BlockSpec((c_pad, d), lambda i: (0, 0))

    grid_spec = pltpu.PrefetchScalarGridSpec(
        num_scalar_prefetch=0,
        grid=(num_tiles,),
        in_specs=[feat_spec, feat_spec, logit_spec, logit_spec,
                  cent_spec, cent_spec],
        out_specs=(
            pl.BlockSpec((1, 1), lambda i: (0, 0),
                         memory_space=pltpu.MemorySpace.SMEM),
            cent_spec,
            cent_spec,
        ),
        scratch_shapes=[
            pltpu.VMEM((c_pad, d), f32),   # s per-class weighted feature sums
            pltpu.VMEM((c_pad, 1), f32),   # s per-class counts
            pltpu.VMEM((c_pad, d), f32),   # t per-class weighted feature sums
            pltpu.VMEM((c_pad, 1), f32),   # t per-class counts
        ],
    )

    cost = pl.CostEstimate(
        flops=4 * n * c_pad * d,                     # two (c_pad,N)x(N,d) matmuls
        transcendentals=0,
        bytes_accessed=(2 * n * d * feat_bytes       # two feature streams
                        + 2 * c_pad * n * 4          # two transposed logit streams
                        + 4 * c_pad * d * 4          # centroids in + out
                        + 4),
    )

    loss, new_s, new_t = pl.pallas_call(
        kernel,
        out_shape=(
            jax.ShapeDtypeStruct((1, 1), f32),
            jax.ShapeDtypeStruct((c_pad, d), f32),
            jax.ShapeDtypeStruct((c_pad, d), f32),
        ),
        grid_spec=grid_spec,
        input_output_aliases={4: 1, 5: 2},           # in-place centroid EMA
        compiler_params=pltpu.CompilerParams(
            dimension_semantics=("arbitrary",),      # batch axis is a reduction
            vmem_limit_bytes=_VMEM_LIMIT,            # budgeted for v7x's 64 MiB
        ),
        cost_estimate=cost,
    )(s_feature, t_feature, y_s_t, y_t_t, s_cent, t_cent)

    return loss[0, 0], new_s[:c], new_t[:c]


def _reference(s_feature, t_feature, y_s, y_t, s_centroid, t_centroid):
    """Pure-JAX replica of the torch forward for validation."""
    n_class = y_s.shape[1]

    def one(y, feat):
        labels = jnp.argmax(y, axis=1)
        logits = jnp.max(y, axis=1)
        counts = jnp.maximum(jnp.zeros(n_class).at[labels].add(1.0), 1.0)
        sel = jnp.where(logits > THRESHOLD, logits, 0.0)
        sums = jnp.zeros((n_class, feat.shape[1])).at[labels].add(sel[:, None] * feat)
        return sums / counts[:, None]

    cur_s, cur_t = one(y_s, s_feature), one(y_t, t_feature)
    ns = (1.0 - DECAY) * s_centroid + DECAY * cur_s
    nt = (1.0 - DECAY) * t_centroid + DECAY * cur_t
    return jnp.mean((ns - nt) ** 2), ns, nt


if __name__ == "__main__":
    key = jax.random.PRNGKey(0)
    C, D = N_CLASS, 256   # D=256 matches the module's centroid width

    def check(k, n, zero_centroids, feat_dtype=jnp.float32):
        ks = jax.random.split(k, 6)
        s_feature = jax.random.normal(ks[0], (n, D), dtype=jnp.float32).astype(feat_dtype)
        t_feature = jax.random.normal(ks[1], (n, D), dtype=jnp.float32).astype(feat_dtype)
        # uniform [0, 1) logits so some max-logits exceed the 0.9 threshold
        y_s = jax.random.uniform(ks[2], (n, C), dtype=jnp.float32)
        y_t = jax.random.uniform(ks[3], (n, C), dtype=jnp.float32)
        if zero_centroids:   # module __init__ state
            s_centroid = jnp.zeros((C, D), jnp.float32)
            t_centroid = jnp.zeros((C, D), jnp.float32)
        else:
            s_centroid = 0.1 * jax.random.normal(ks[4], (C, D), dtype=jnp.float32)
            t_centroid = 0.1 * jax.random.normal(ks[5], (C, D), dtype=jnp.float32)

        loss, new_s, new_t = semantic_loss(s_feature, t_feature, y_s, y_t,
                                           s_centroid, t_centroid)
        jax.block_until_ready((loss, new_s, new_t))

        ref_loss, ref_s, ref_t = _reference(s_feature.astype(jnp.float32),
                                            t_feature.astype(jnp.float32),
                                            y_s, y_t, s_centroid, t_centroid)
        np.testing.assert_allclose(np.asarray(loss), np.asarray(ref_loss),
                                   rtol=1e-4, atol=1e-5)
        np.testing.assert_allclose(np.asarray(new_s), np.asarray(ref_s),
                                   rtol=1e-4, atol=1e-5)
        np.testing.assert_allclose(np.asarray(new_t), np.asarray(ref_t),
                                   rtol=1e-4, atol=1e-5)

    k1, k2, k3 = jax.random.split(key, 3)
    # small shape implied by the module (zero-initialized centroid state)
    check(k1, n=8, zero_centroids=True)
    # single full-extent (non-8-multiple) tile: no padding, no raggedness
    check(k2, n=1100, zero_centroids=False)
    # multi-tile + ragged final tile + bf16 feature streaming (in-kernel cast)
    check(k3, n=4500, zero_centroids=False, feat_dtype=jnp.bfloat16)
    print("KERNEL_OK")
</pallas_src>

<mosaic_0001>
module attributes {stable_mosaic.version = 11 : i64} {
  func.func @kernel(%arg0: i32, %arg1: memref<8x256xf32, #tpu.memory_space<vmem>>, %arg2: memref<8x256xf32, #tpu.memory_space<vmem>>, %arg3: memref<8x8xf32, #tpu.memory_space<vmem>>, %arg4: memref<8x8xf32, #tpu.memory_space<vmem>>, %arg5: memref<8x256xf32, #tpu.memory_space<vmem>>, %arg6: memref<8x256xf32, #tpu.memory_space<vmem>>, %arg7: memref<1x1xf32, #tpu.memory_space<smem>>, %arg8: memref<8x256xf32, #tpu.memory_space<vmem>>, %arg9: memref<8x256xf32, #tpu.memory_space<vmem>>, %arg10: memref<8x256xf32, #tpu.memory_space<vmem>>, %arg11: memref<8x1xf32, #tpu.memory_space<vmem>>, %arg12: memref<8x256xf32, #tpu.memory_space<vmem>>, %arg13: memref<8x1xf32, #tpu.memory_space<vmem>>) attributes {dimension_semantics = [#tpu.dimension_semantics<arbitrary>], iteration_bounds = array<i64: 1>, scalar_prefetch = 0 : i64, scratch_operands = 4 : i64, tpu.core_type = #tpu.core_type<tc>, window_params = [{transform_indices = @transform_0, window_bounds = array<i64: 8, 256>}, {transform_indices = @transform_1, window_bounds = array<i64: 8, 256>}, {transform_indices = @transform_2, window_bounds = array<i64: 8, 8>}, {transform_indices = @transform_3, window_bounds = array<i64: 8, 8>}, {pipeline_mode = #tpu.pipeline_mode<synchronous>, transform_indices = @transform_4, window_bounds = array<i64: 8, 256>}, {pipeline_mode = #tpu.pipeline_mode<synchronous>, transform_indices = @transform_5, window_bounds = array<i64: 8, 256>}, {transform_indices = @transform_6, window_bounds = array<i64: 1, 1>}, {pipeline_mode = #tpu.pipeline_mode<synchronous>, transform_indices = @transform_7, window_bounds = array<i64: 8, 256>}, {pipeline_mode = #tpu.pipeline_mode<synchronous>, transform_indices = @transform_8, window_bounds = array<i64: 8, 256>}]} {
    %c0_i32 = arith.constant 0 : i32
    %0 = arith.cmpi eq, %arg0, %c0_i32 : i32
    %1 = arith.extui %0 : i1 to i32
    %c0_i32_0 = arith.constant 0 : i32
    %2 = arith.cmpi ne, %1, %c0_i32_0 : i32
    scf.if %2 {
      %cst_50 = arith.constant 0.000000e+00 : f32
      %108 = vector.broadcast %cst_50 : f32 to vector<8x256xf32>
      %c0_51 = arith.constant 0 : index
      %c0_52 = arith.constant 0 : index
      %109 = vector.load %arg10[%c0_51, %c0_52] : memref<8x256xf32, #tpu.memory_space<vmem>>, vector<8x256xf32>
      tpu.vector_store %arg10[%c0_51, %c0_52], %108 {strides = array<i32>} : memref<8x256xf32, #tpu.memory_space<vmem>>, vector<8x256xf32>,
      %cst_53 = arith.constant 0.000000e+00 : f32
      %110 = vector.broadcast %cst_53 : f32 to vector<8x256xf32>
      %c0_54 = arith.constant 0 : index
      %c0_55 = arith.constant 0 : index
      %111 = vector.load %arg12[%c0_54, %c0_55] : memref<8x256xf32, #tpu.memory_space<vmem>>, vector<8x256xf32>
      tpu.vector_store %arg12[%c0_54, %c0_55], %110 {strides = array<i32>} : memref<8x256xf32, #tpu.memory_space<vmem>>, vector<8x256xf32>,
      %cst_56 = arith.constant 0.000000e+00 : f32
      %112 = vector.broadcast %cst_56 : f32 to vector<8x1xf32>
      %c0_57 = arith.constant 0 : index
      %c0_58 = arith.constant 0 : index
      %113 = vector.load %arg11[%c0_57, %c0_58] : memref<8x1xf32, #tpu.memory_space<vmem>>, vector<8x1xf32>
      tpu.vector_store %arg11[%c0_57, %c0_58], %112 {strides = array<i32>} : memref<8x1xf32, #tpu.memory_space<vmem>>, vector<8x1xf32>,
      %cst_59 = arith.constant 0.000000e+00 : f32
      %114 = vector.broadcast %cst_59 : f32 to vector<8x1xf32>
      %c0_60 = arith.constant 0 : index
      %c0_61 = arith.constant 0 : index
      %115 = vector.load %arg13[%c0_60, %c0_61] : memref<8x1xf32, #tpu.memory_space<vmem>>, vector<8x1xf32>
      tpu.vector_store %arg13[%c0_60, %c0_61], %114 {strides = array<i32>} : memref<8x1xf32, #tpu.memory_space<vmem>>, vector<8x1xf32>,
    } else {
    }
    %c0 = arith.constant 0 : index
    %c0_1 = arith.constant 0 : index
    %3 = vector.load %arg3[%c0, %c0_1] : memref<8x8xf32, #tpu.memory_space<vmem>>, vector<8x8xf32>
    %cst = arith.constant dense<0xFF800000> : vector<8xf32>
    %4 = vector.multi_reduction <maximumf>, %3, %cst [0] : vector<8x8xf32> to vector<8xf32>
    %5 = vector.shape_cast %4 : vector<8xf32> to vector<1x8xf32>
    %6 = tpu.iota {dimensions = array<i32: 0>} : vector<8x8xi32>
    %7 = vector.broadcast %5 : vector<1x8xf32> to vector<8x8xf32>
    %8 = arith.cmpf oeq, %3, %7 : vector<8x8xf32>
    %c8_i32 = arith.constant 8 : i32
    %9 = vector.broadcast %c8_i32 : i32 to vector<8x8xi32>
    %10 = arith.select %8, %6, %9 : vector<8x8xi1>, vector<8x8xi32>
    %cst_2 = arith.constant dense<2147483647> : vector<8xi32>
    %11 = vector.multi_reduction <minsi>, %10, %cst_2 [0] : vector<8x8xi32> to vector<8xi32>
    %12 = vector.shape_cast %11 : vector<8xi32> to vector<1x8xi32>
    %13 = vector.broadcast %12 : vector<1x8xi32> to vector<8x8xi32>
    %14 = arith.cmpi eq, %6, %13 : vector<8x8xi32>
    %15 = arith.extui %14 : vector<8x8xi1> to vector<8x8xi32>
    %16 = arith.sitofp %15 : vector<8x8xi32> to vector<8x8xf32>
    %17 = tpu.iota {dimensions = array<i32: 1>} : vector<1x8xi32>
    %c8_i32_3 = arith.constant 8 : i32
    %18 = arith.muli %arg0, %c8_i32_3 : i32
    %19 = vector.broadcast %18 : i32 to vector<1x8xi32>
    %20 = arith.addi %19, %17 : vector<1x8xi32>
    %c8_i32_4 = arith.constant 8 : i32
    %21 = vector.broadcast %c8_i32_4 : i32 to vector<1x8xi32>
    %22 = arith.cmpi slt, %20, %21 : vector<1x8xi32>
    %cst_5 = arith.constant 0.000000e+00 : f32
    %23 = vector.shape_cast %22 : vector<1x8xi1> to vector<1x8xi1>
    %24 = vector.broadcast %23 : vector<1x8xi1> to vector<8x8xi1>
    %25 = vector.broadcast %cst_5 : f32 to vector<8x8xf32>
    %26 = arith.select %24, %16, %25 : vector<8x8xi1>, vector<8x8xf32>
    %27 = tpu.iota {dimensions = array<i32: 0>} : vector<8x1xi32>
    %c8_i32_6 = arith.constant 8 : i32
    %28 = arith.muli %arg0, %c8_i32_6 : i32
    %29 = vector.broadcast %28 : i32 to vector<8x1xi32>
    %30 = arith.addi %29, %27 : vector<8x1xi32>
    %c8_i32_7 = arith.constant 8 : i32
    %31 = vector.broadcast %c8_i32_7 : i32 to vector<8x1xi32>
    %32 = arith.cmpi slt, %30, %31 : vector<8x1xi32>
    %c0_8 = arith.constant 0 : index
    %c0_9 = arith.constant 0 : index
    %33 = vector.load %arg1[%c0_8, %c0_9] : memref<8x256xf32, #tpu.memory_space<vmem>>, vector<8x256xf32>
    %cst_10 = arith.constant 0.000000e+00 : f32
    %34 = vector.shape_cast %32 : vector<8x1xi1> to vector<8x1xi1>
    %35 = vector.broadcast %34 : vector<8x1xi1> to vector<8x256xi1>
    %36 = vector.broadcast %cst_10 : f32 to vector<8x256xf32>
    %37 = arith.select %35, %33, %36 : vector<8x256xi1>, vector<8x256xf32>
    %c0_11 = arith.constant 0 : index
    %c0_12 = arith.constant 0 : index
    %38 = vector.load %arg11[%c0_11, %c0_12] : memref<8x1xf32, #tpu.memory_space<vmem>>, vector<8x1xf32>
    %cst_13 = arith.constant dense<0.000000e+00> : vector<8xf32>
    %39 = vector.multi_reduction <add>, %26, %cst_13 [1] : vector<8x8xf32> to vector<8xf32>
    %40 = vector.shape_cast %39 : vector<8xf32> to vector<8x1xf32>
    %41 = arith.addf %38, %40 : vector<8x1xf32>
    %c0_14 = arith.constant 0 : index
    %c0_15 = arith.constant 0 : index
    %42 = vector.load %arg11[%c0_14, %c0_15] : memref<8x1xf32, #tpu.memory_space<vmem>>, vector<8x1xf32>
    tpu.vector_store %arg11[%c0_14, %c0_15], %41 {strides = array<i32>} : memref<8x1xf32, #tpu.memory_space<vmem>>, vector<8x1xf32>,
    %cst_16 = arith.constant 0.899999976 : f32
    %43 = vector.broadcast %cst_16 : f32 to vector<1x8xf32>
    %44 = arith.cmpf ogt, %5, %43 : vector<1x8xf32>
    %45 = arith.andi %22, %44 : vector<1x8xi1>
    %cst_17 = arith.constant 0.000000e+00 : f32
    %46 = vector.broadcast %cst_17 : f32 to vector<1x8xf32>
    %47 = arith.select %45, %5, %46 : vector<1x8xi1>, vector<1x8xf32>
    %c0_18 = arith.constant 0 : index
    %c0_19 = arith.constant 0 : index
    %48 = vector.load %arg10[%c0_18, %c0_19] : memref<8x256xf32, #tpu.memory_space<vmem>>, vector<8x256xf32>
    %49 = vector.broadcast %47 : vector<1x8xf32> to vector<8x8xf32>
    %50 = arith.mulf %26, %49 : vector<8x8xf32>
    %cst_20 = arith.constant dense<0.000000e+00> : vector<8x256xf32>
    %51 = tpu.matmul %50, %37, %cst_20 {dimension_numbers = #tpu.dot_dimension_numbers<[1], [0], [0], [1], [0, 0, 1, 1], [], []>} : vector<8x8xf32>, vector<8x256xf32>, vector<8x256xf32> -> vector<8x256xf32>
    %52 = arith.addf %48, %51 : vector<8x256xf32>
    %c0_21 = arith.constant 0 : index
    %c0_22 = arith.constant 0 : index
    %53 = vector.load %arg10[%c0_21, %c0_22] : memref<8x256xf32, #tpu.memory_space<vmem>>, vector<8x256xf32>
    tpu.vector_store %arg10[%c0_21, %c0_22], %52 {strides = array<i32>} : memref<8x256xf32, #tpu.memory_space<vmem>>, vector<8x256xf32>,
    %c0_23 = arith.constant 0 : index
    %c0_24 = arith.constant 0 : index
    %54 = vector.load %arg4[%c0_23, %c0_24] : memref<8x8xf32, #tpu.memory_space<vmem>>, vector<8x8xf32>
    %cst_25 = arith.constant dense<0xFF800000> : vector<8xf32>
    %55 = vector.multi_reduction <maximumf>, %54, %cst_25 [0] : vector<8x8xf32> to vector<8xf32>
    %56 = vector.shape_cast %55 : vector<8xf32> to vector<1x8xf32>
    %57 = tpu.iota {dimensions = array<i32: 0>} : vector<8x8xi32>
    %58 = vector.broadcast %56 : vector<1x8xf32> to vector<8x8xf32>
    %59 = arith.cmpf oeq, %54, %58 : vector<8x8xf32>
    %c8_i32_26 = arith.constant 8 : i32
    %60 = vector.broadcast %c8_i32_26 : i32 to vector<8x8xi32>
    %61 = arith.select %59, %57, %60 : vector<8x8xi1>, vector<8x8xi32>
    %cst_27 = arith.constant dense<2147483647> : vector<8xi32>
    %62 = vector.multi_reduction <minsi>, %61, %cst_27 [0] : vector<8x8xi32> to vector<8xi32>
    %63 = vector.shape_cast %62 : vector<8xi32> to vector<1x8xi32>
    %64 = vector.broadcast %63 : vector<1x8xi32> to vector<8x8xi32>
    %65 = arith.cmpi eq, %57, %64 : vector<8x8xi32>
    %66 = arith.extui %65 : vector<8x8xi1> to vector<8x8xi32>
    %67 = arith.sitofp %66 : vector<8x8xi32> to vector<8x8xf32>
    %68 = tpu.iota {dimensions = array<i32: 1>} : vector<1x8xi32>
    %c8_i32_28 = arith.constant 8 : i32
    %69 = arith.muli %arg0, %c8_i32_28 : i32
    %70 = vector.broadcast %69 : i32 to vector<1x8xi32>
    %71 = arith.addi %70, %68 : vector<1x8xi32>
    %c8_i32_29 = arith.constant 8 : i32
    %72 = vector.broadcast %c8_i32_29 : i32 to vector<1x8xi32>
    %73 = arith.cmpi slt, %71, %72 : vector<1x8xi32>
    %cst_30 = arith.constant 0.000000e+00 : f32
    %74 = vector.shape_cast %73 : vector<1x8xi1> to vector<1x8xi1>
    %75 = vector.broadcast %74 : vector<1x8xi1> to vector<8x8xi1>
    %76 = vector.broadcast %cst_30 : f32 to vector<8x8xf32>
    %77 = arith.select %75, %67, %76 : vector<8x8xi1>, vector<8x8xf32>
    %78 = tpu.iota {dimensions = array<i32: 0>} : vector<8x1xi32>
    %c8_i32_31 = arith.constant 8 : i32
    %79 = arith.muli %arg0, %c8_i32_31 : i32
    %80 = vector.broadcast %79 : i32 to vector<8x1xi32>
    %81 = arith.addi %80, %78 : vector<8x1xi32>
    %c8_i32_32 = arith.constant 8 : i32
    %82 = vector.broadcast %c8_i32_32 : i32 to vector<8x1xi32>
    %83 = arith.cmpi slt, %81, %82 : vector<8x1xi32>
    %c0_33 = arith.constant 0 : index
    %c0_34 = arith.constant 0 : index
    %84 = vector.load %arg2[%c0_33, %c0_34] : memref<8x256xf32, #tpu.memory_space<vmem>>, vector<8x256xf32>
    %cst_35 = arith.constant 0.000000e+00 : f32
    %85 = vector.shape_cast %83 : vector<8x1xi1> to vector<8x1xi1>
    %86 = vector.broadcast %85 : vector<8x1xi1> to vector<8x256xi1>
    %87 = vector.broadcast %cst_35 : f32 to vector<8x256xf32>
    %88 = arith.select %86, %84, %87 : vector<8x256xi1>, vector<8x256xf32>
    %c0_36 = arith.constant 0 : index
    %c0_37 = arith.constant 0 : index
    %89 = vector.load %arg13[%c0_36, %c0_37] : memref<8x1xf32, #tpu.memory_space<vmem>>, vector<8x1xf32>
    %cst_38 = arith.constant dense<0.000000e+00> : vector<8xf32>
    %90 = vector.multi_reduction <add>, %77, %cst_38 [1] : vector<8x8xf32> to vector<8xf32>
    %91 = vector.shape_cast %90 : vector<8xf32> to vector<8x1xf32>
    %92 = arith.addf %89, %91 : vector<8x1xf32>
    %c0_39 = arith.constant 0 : index
    %c0_40 = arith.constant 0 : index
    %93 = vector.load %arg13[%c0_39, %c0_40] : memref<8x1xf32, #tpu.memory_space<vmem>>, vector<8x1xf32>
    tpu.vector_store %arg13[%c0_39, %c0_40], %92 {strides = array<i32>} : memref<8x1xf32, #tpu.memory_space<vmem>>, vector<8x1xf32>,
    %cst_41 = arith.constant 0.899999976 : f32
    %94 = vector.broadcast %cst_41 : f32 to vector<1x8xf32>
    %95 = arith.cmpf ogt, %56, %94 : vector<1x8xf32>
    %96 = arith.andi %73, %95 : vector<1x8xi1>
    %cst_42 = arith.constant 0.000000e+00 : f32
    %97 = vector.broadcast %cst_42 : f32 to vector<1x8xf32>
    %98 = arith.select %96, %56, %97 : vector<1x8xi1>, vector<1x8xf32>
    %c0_43 = arith.constant 0 : index
    %c0_44 = arith.constant 0 : index
    %99 = vector.load %arg12[%c0_43, %c0_44] : memref<8x256xf32, #tpu.memory_space<vmem>>, vector<8x256xf32>
    %100 = vector.broadcast %98 : vector<1x8xf32> to vector<8x8xf32>
    %101 = arith.mulf %77, %100 : vector<8x8xf32>
    %cst_45 = arith.constant dense<0.000000e+00> : vector<8x256xf32>
    %102 = tpu.matmul %101, %88, %cst_45 {dimension_numbers = #tpu.dot_dimension_numbers<[1], [0], [0], [1], [0, 0, 1, 1], [], []>} : vector<8x8xf32>, vector<8x256xf32>, vector<8x256xf32> -> vector<8x256xf32>
    %103 = arith.addf %99, %102 : vector<8x256xf32>
    %c0_46 = arith.constant 0 : index
    %c0_47 = arith.constant 0 : index
    %104 = vector.load %arg12[%c0_46, %c0_47] : memref<8x256xf32, #tpu.memory_space<vmem>>, vector<8x256xf32>
    tpu.vector_store %arg12[%c0_46, %c0_47], %103 {strides = array<i32>} : memref<8x256xf32, #tpu.memory_space<vmem>>, vector<8x256xf32>,
    %c0_i32_48 = arith.constant 0 : i32
    %105 = arith.cmpi eq, %arg0, %c0_i32_48 : i32
    %106 = arith.extui %105 : i1 to i32
    %c0_i32_49 = arith.constant 0 : i32
    %107 = arith.cmpi ne, %106, %c0_i32_49 : i32
    scf.if %107 {
      %c0_50 = arith.constant 0 : index
      %c0_51 = arith.constant 0 : index
      %108 = vector.load %arg10[%c0_50, %c0_51] : memref<8x256xf32, #tpu.memory_space<vmem>>, vector<8x256xf32>
      %c0_52 = arith.constant 0 : index
      %c0_53 = arith.constant 0 : index
      %109 = vector.load %arg11[%c0_52, %c0_53] : memref<8x1xf32, #tpu.memory_space<vmem>>, vector<8x1xf32>
      %cst_54 = arith.constant 1.000000e+00 : f32
      %110 = vector.broadcast %cst_54 : f32 to vector<8x1xf32>
      %111 = arith.maximumf %109, %110 : vector<8x1xf32>
      %112 = vector.broadcast %111 : vector<8x1xf32> to vector<8x256xf32>
      %113 = arith.divf %108, %112 : vector<8x256xf32>
      %c0_55 = arith.constant 0 : index
      %c0_56 = arith.constant 0 : index
      %114 = vector.load %arg12[%c0_55, %c0_56] : memref<8x256xf32, #tpu.memory_space<vmem>>, vector<8x256xf32>
      %c0_57 = arith.constant 0 : index
      %c0_58 = arith.constant 0 : index
      %115 = vector.load %arg13[%c0_57, %c0_58] : memref<8x1xf32, #tpu.memory_space<vmem>>, vector<8x1xf32>
      %cst_59 = arith.constant 1.000000e+00 : f32
      %116 = vector.broadcast %cst_59 : f32 to vector<8x1xf32>
      %117 = arith.maximumf %115, %116 : vector<8x1xf32>
      %118 = vector.broadcast %117 : vector<8x1xf32> to vector<8x256xf32>
      %119 = arith.divf %114, %118 : vector<8x256xf32>
      %c0_60 = arith.constant 0 : index
      %c0_61 = arith.constant 0 : index
      %120 = vector.load %arg5[%c0_60, %c0_61] : memref<8x256xf32, #tpu.memory_space<vmem>>, vector<8x256xf32>
      %cst_62 = arith.constant 0.699999988 : f32
      %121 = vector.broadcast %cst_62 : f32 to vector<8x256xf32>
      %122 = arith.mulf %121, %120 : vector<8x256xf32>
      %cst_63 = arith.constant 3.000000e-01 : f32
      %123 = vector.broadcast %cst_63 : f32 to vector<8x256xf32>
      %124 = arith.mulf %123, %113 : vector<8x256xf32>
      %125 = arith.addf %122, %124 : vector<8x256xf32>
      %c0_64 = arith.constant 0 : index
      %c0_65 = arith.constant 0 : index
      %126 = vector.load %arg6[%c0_64, %c0_65] : memref<8x256xf32, #tpu.memory_space<vmem>>, vector<8x256xf32>
      %cst_66 = arith.constant 0.699999988 : f32
      %127 = vector.broadcast %cst_66 : f32 to vector<8x256xf32>
      %128 = arith.mulf %127, %126 : vector<8x256xf32>
      %cst_67 = arith.constant 3.000000e-01 : f32
      %129 = vector.broadcast %cst_67 : f32 to vector<8x256xf32>
      %130 = arith.mulf %129, %119 : vector<8x256xf32>
      %131 = arith.addf %128, %130 : vector<8x256xf32>
      %c0_68 = arith.constant 0 : index
      %c0_69 = arith.constant 0 : index
      %132 = vector.load %arg8[%c0_68, %c0_69] : memref<8x256xf32, #tpu.memory_space<vmem>>, vector<8x256xf32>
      tpu.vector_store %arg8[%c0_68, %c0_69], %125 {strides = array<i32>} : memref<8x256xf32, #tpu.memory_space<vmem>>, vector<8x256xf32>,
      %c0_70 = arith.constant 0 : index
      %c0_71 = arith.constant 0 : index
      %133 = vector.load %arg9[%c0_70, %c0_71] : memref<8x256xf32, #tpu.memory_space<vmem>>, vector<8x256xf32>
      tpu.vector_store %arg9[%c0_70, %c0_71], %131 {strides = array<i32>} : memref<8x256xf32, #tpu.memory_space<vmem>>, vector<8x256xf32>,
      %134 = arith.subf %125, %131 : vector<8x256xf32>
      %135 = arith.mulf %134, %134 : vector<8x256xf32>
      %136 = vector.shape_cast %135 : vector<8x256xf32> to vector<1x8x256xf32>
      %cst_72 = arith.constant dense<0.000000e+00> : vector<1xf32>
      %137 = vector.multi_reduction <add>, %136, %cst_72 [1, 2] : vector<1x8x256xf32> to vector<1xf32>
      %138 = vector.shape_cast %137 : vector<1xf32> to vector<1x1x1xf32>
      %139 = vector.extract %138[0, 0, 0] : f32 from vector<1x1x1xf32>
      %cst_73 = arith.constant 9.765625E-4 : f32
      %140 = arith.mulf %139, %cst_73 : f32
      %c0_74 = arith.constant 0 : index
      %c0_75 = arith.constant 0 : index
      %141 = memref.load %arg7[%c0_74, %c0_75] : memref<1x1xf32, #tpu.memory_space<smem>>
      memref.store %140, %arg7[%c0_74, %c0_75] : memref<1x1xf32, #tpu.memory_space<smem>>
    } else {
    }
    return
  }
  func.func @transform_0(%arg0: i32) -> (i32, i32) {
    %c0_i32 = arith.constant 0 : i32
    %c0_i32_0 = arith.constant 0 : i32
    return %arg0, %c0_i32 : i32, i32
  }
  func.func @transform_1(%arg0: i32) -> (i32, i32) {
    %c0_i32 = arith.constant 0 : i32
    %c0_i32_0 = arith.constant 0 : i32
    return %arg0, %c0_i32 : i32, i32
  }
  func.func @transform_2(%arg0: i32) -> (i32, i32) {
    %c0_i32 = arith.constant 0 : i32
    %c0_i32_0 = arith.constant 0 : i32
    return %c0_i32, %arg0 : i32, i32
  }
  func.func @transform_3(%arg0: i32) -> (i32, i32) {
    %c0_i32 = arith.constant 0 : i32
    %c0_i32_0 = arith.constant 0 : i32
    return %c0_i32, %arg0 : i32, i32
  }
  func.func @transform_4(%arg0: i32) -> (i32, i32) {
    %c0_i32 = arith.constant 0 : i32
    %c0_i32_0 = arith.constant 0 : i32
    %c0_i32_1 = arith.constant 0 : i32
    return %c0_i32, %c0_i32_0 : i32, i32
  }
  func.func @transform_5(%arg0: i32) -> (i32, i32) {
    %c0_i32 = arith.constant 0 : i32
    %c0_i32_0 = arith.constant 0 : i32
    %c0_i32_1 = arith.constant 0 : i32
    return %c0_i32, %c0_i32_0 : i32, i32
  }
  func.func @transform_6(%arg0: i32) -> (i32, i32) {
    %c0_i32 = arith.constant 0 : i32
    %c0_i32_0 = arith.constant 0 : i32
    %c0_i32_1 = arith.constant 0 : i32
    return %c0_i32, %c0_i32_0 : i32, i32
  }
  func.func @transform_7(%arg0: i32) -> (i32, i32) {
    %c0_i32 = arith.constant 0 : i32
    %c0_i32_0 = arith.constant 0 : i32
    %c0_i32_1 = arith.constant 0 : i32
    return %c0_i32, %c0_i32_0 : i32, i32
  }
  func.func @transform_8(%arg0: i32) -> (i32, i32) {
    %c0_i32 = arith.constant 0 : i32
    %c0_i32_0 = arith.constant 0 : i32
    %c0_i32_1 = arith.constant 0 : i32
    return %c0_i32, %c0_i32_0 : i32, i32
  }
}

</mosaic_0001>

<bundles_post_ra>
// kernel: semantic_loss.1
= control target key start
LH: loop header
LB: loop body
LE: loop exit
PB: predicated region body
PF: predicated region fallthrough
CT: control target
= control target key end

     0   :  { %vm39_vm0 = vcmask 64512   ;;  %v402_v6 = vmov 0.0   ;;  %s528_s0 = inlined_call_operand.vmem [shape: f32[8,256], index: 0, kind: input, shape index: {}]   ;;  %s529_s1 = inlined_call_operand.vmem [shape: f32[8,256], index: 1, kind: input, shape index: {}]   ;;  %s530_s2 = inlined_call_operand.vmem [shape: f32[8,8], index: 2, kind: input, shape index: {}]   ;;  %s531_s3 = inlined_call_operand.vmem [shape: f32[8,8], index: 3, kind: input, shape index: {}]   ;;  %s532_s4 = inlined_call_operand.vmem [shape: f32[8,256], index: 4, kind: input, shape index: {}, may-alias: {4,7}]   ;;  %s533_s5 = inlined_call_operand.vmem [shape: f32[8,256], index: 5, kind: input, shape index: {}, may-alias: {5,8}]   ;;  %s534_s6 = inlined_call_operand.hbm [shape: f32[1,1], index: 6, kind: output, shape index: {0}]   ;;  %s535_s7 = inlined_call_operand.vmem [shape: f32[8,256], index: 7, kind: output, shape index: {1}, may-alias: {4,7}]   ;;  %s536_s8 = inlined_call_operand.vmem [shape: f32[8,256], index: 8, kind: output, shape index: {2}, may-alias: {5,8}]  }
   0x1   :  { %v38_v0 = vld [vmem:[%s530_s2] sm:$0xff]  ;;  %v76_v2 = vld [vmem:[%s528_s0 + $0x8] sm:$0xff]  ;;  %161 = vmatprep.mubr.f32.mxu0 %v402_v6 }
   0x2   :  { %v172_v1 = vld [vmem:[%s531_s3] sm:$0xff]  ;;  %v40_v3 = vsel %vm39_vm0, %v38_v0, -inf  ;;  %97 = vmatprep.subr.mxu0 %v76_v2  ;;  %v197_v7 = vld [vmem:[%s529_s1 + $0x8] sm:$0xff] }
   0x3   :  { %v173_v4 = vsel %vm39_vm0, %v172_v1, -inf  ;;  %v75_v5 = vld [vmem:[%s528_s0] sm:$0xff]  ;;  %v41_v9 = vrot.slane %v40_v3, 4  ;;  %215 = vmatprep.subr.mxu1 %v197_v7 }
   0x4   :  { %v196_v8 = vld [vmem:[%s529_s1] sm:$0xff]  ;;  %v174_v10 = vrot.slane %v173_v4, 4  ;;  %98 = vmatpush1.msra.mxu0 %v75_v5 }
   0x5   :  { %14 = vsyncpa [#allocation7], 0  ;;  %216 = vmatpush1.msra.mxu1 %v196_v8  ;;  %279 = vmatprep.mubr.f32.mxu1 %v402_v6  ;;  %v42_v11 = vmax.f32 %v40_v3, %v41_v9  ;;  %v47_v15 = vlaneseq  ;;  %v403_v51 = vmov 0   ;;  %v318_v5 = vld [vmem:[%s532_s4 + $0x8] sm:$0xff] }
   0x6   :  { %v175_v12 = vmax.f32 %v173_v4, %v174_v10  ;;  %384 = vset.pattern.permute.xlu1 %v403_v51  ;;  %385 = vset.pattern.permute.xlu0 %v403_v51  ;;  %v317_v4 = vld [vmem:[%s532_s4] sm:$0xff]  ;;  %v320_v10 = vmul.f32 0.7, %v318_v5 }
   0x7   :  { %v43_v13 = vrot.slane %v42_v11, 2  ;;  %v48_v20 = vshrl.u32 %v47_v15, 7  ;;  %v65_v30 = vand.u32 127, %v47_v15  ;;  %v319_v8 = vmul.f32 0.7, %v317_v4 }
   0x8   :  { %v176_v14 = vrot.slane %v175_v12, 2 }
   0x9   :  { %v44_v16 = vmax.f32 %v42_v11, %v43_v13  ;;  %vm69_vm9 = vcmp.lt.s32.totalorder %v65_v30, 8  ;;  %v325_v11 = vld [vmem:[%s533_s5] sm:$0xff] }
   0xa   :  { %v177_v17 = vmax.f32 %v175_v12, %v176_v14  ;;  %v326_v12 = vld [vmem:[%s533_s5 + $0x8] sm:$0xff] }
   0xb   :  { %v45_v18 = vrot.slane %v44_v16, 1 }
   0xc   :  { %v178_v19 = vrot.slane %v177_v17, 1 }
   0xd   :  { %v46_v21 = vmax.f32 %v44_v16, %v45_v18  ;;  %v327_v16 = vmul.f32 0.7, %v325_v11 }
   0xe   :  { %v179_v22 = vmax.f32 %v177_v17, %v178_v19  ;;  %v328_v17 = vmul.f32 0.7, %v326_v12 }
   0xf   :  { %vm49_vm1 = vcmp.eq.f32.partialorder %v38_v0, %v46_v21  ;;  %vm88_vm5 = vcmp.gt.f32.partialorder %v46_v21, 0.9 }
  0x10   :  { %vm180_vm2 = vcmp.eq.f32.partialorder %v172_v1, %v179_v22  ;;  %v50_v23 = vsel %vm49_vm1, %v48_v20, 8  ;;  %vm206_vm8 = vcmp.gt.f32.partialorder %v179_v22, 0.9  ;;  %vm475_vm10 = vmand %vm69_vm9, %vm88_vm5  ;;  %vm35_vm1 = vcmask 7168  }
  0x11   :  { %v181_v24 = vsel %vm180_vm2, %v48_v20, 8  ;;  %v51_v25 = vsel %vm39_vm0, %v50_v23, 2147483647  ;;  %vm207_vm11 = vmand %vm69_vm9, %vm206_vm8  ;;  %v90_v41 = vsel %vm475_vm10, %v46_v21, 0.0  ;;  %36 = vst.msk [vmem:[#allocation3] sm:$0xff] %vm35_vm1, %v402_v6 }
  0x12   :  { %v182_v26 = vsel %vm39_vm0, %v181_v24, 2147483647  ;;  %v52_v27 = vrot.slane %v51_v25, 4  ;;  %v208_v42 = vsel %vm207_vm11, %v179_v22, 0.0  ;;  %37 = vst.msk [vmem:[#allocation5] sm:$0xff] %vm35_vm1, %v402_v6 }
  0x13   :  { %v183_v28 = vrot.slane %v182_v26, 4 }
  0x14   :  { %vm53_vm3 = vcmp.lt.s32.totalorder %v51_v25, %v52_v27 }
  0x15   :  { %vm184_vm4 = vcmp.lt.s32.totalorder %v182_v26, %v183_v28  ;;  %v54_v29 = vsel %vm53_vm3, %v51_v25, %v52_v27 }
  0x16   :  { %v185_v31 = vsel %vm184_vm4, %v182_v26, %v183_v28  ;;  %v55_v32 = vrot.slane %v54_v29, 2 }
  0x17   :  { %v186_v33 = vrot.slane %v185_v31, 2 }
  0x18   :  { %vm56_vm6 = vcmp.lt.s32.totalorder %v54_v29, %v55_v32  ;;  %v81_v52 = vld [vmem:[#allocation3] sm:$0xff] }
  0x19   :  { %vm187_vm7 = vcmp.lt.s32.totalorder %v185_v31, %v186_v33  ;;  %v57_v34 = vsel %vm56_vm6, %v54_v29, %v55_v32  ;;  %v200_v55 = vld [vmem:[#allocation5] sm:$0xff] }
  0x1a   :  { %v188_v35 = vsel %vm187_vm7, %v185_v31, %v186_v33  ;;  %v58_v36 = vrot.slane %v57_v34, 1 }
  0x1b   :  { %v189_v38 = vrot.slane %v188_v35, 1 }
  0x1c   :  { %vm59_vm12 = vcmp.lt.s32.totalorder %v57_v34, %v58_v36 }
  0x1d   :  { %vm190_vm13 = vcmp.lt.s32.totalorder %v188_v35, %v189_v38  ;;  %v60_v39 = vsel %vm59_vm12, %v57_v34, %v58_v36 }
  0x1e   :  { %v191_v40 = vsel %vm190_vm13, %v188_v35, %v189_v38  ;;  %vm61_vm14 = vcmp.eq.s32.totalorder %v48_v20, %v60_v39 }
  0x1f   :  { %vm192_vm15 = vcmp.eq.s32.totalorder %v48_v20, %v191_v40  ;;  %v375_v43 = vsel %vm61_vm14, 1.0, %v402_v6 }
  0x20   :  { %v377_v44 = vsel %vm192_vm15, 1.0, %v402_v6  ;;  %v72_v45 = vsel %vm69_vm9, %v375_v43, 0.0 }
  0x21   :  { %v195_v46 = vsel %vm69_vm9, %v377_v44, 0.0  ;;  %v82_v47 = vsel %vm39_vm0, %v72_v45, 0.0  ;;  %v93_v48 = vmul.f32 %v90_v41, %v72_v45 }
  0x22   :  { %v211_v49 = vmul.f32 %v208_v42, %v195_v46  ;;  %83 = vadd.xlane.f32.xlu0 %v82_v47  ;;  %v201_v50 = vsel %vm39_vm0, %v195_v46, 0.0 }
  0x23   :  { %376 = vmatmul.mubr.msk.f32.vlgmr.msra.gmra.mrb[0].mxu0 %vm39_vm0, %v93_v48 }
  0x24   :  { %378 = vmatmul.mubr.msk.f32.vlgmr.msra.gmra.mrb[0].mxu1 %vm39_vm0, %v211_v49 }
  0x26   :  { %202 = vadd.xlane.f32.xlu0 %v201_v50 }
  0xaf   :  { %v84_v53 = vpop.xlane.xlu0 %83 }
  0xb0   :  { %v85_v54 = vadd.f32 %v84_v53, %v81_v52 }
  0xb2   :  { %87 = vst.msk [vmem:[#allocation3] sm:$0xff] %vm35_vm1, %v85_v54 }
  0xb3   :  { %v203_v56 = vpop.xlane.xlu0 %202 }
  0xb4   :  { %v204_v57 = vadd.f32 %v203_v56, %v200_v55 }
  0xb6   :  { %205 = vst.msk [vmem:[#allocation5] sm:$0xff] %vm35_vm1, %v204_v57 }
  0xb9   :  { %v295_v58 = vld [vmem:[#allocation3] sm:$0xff] }
  0xba   :  { %v296_v59 = vmax.f32 %v295_v58, 1.0 }
  0xbc   :  { %299 = vperm.xlu1 %384, %v296_v59  }
  0xbd   :  { %v307_v60 = vld [vmem:[#allocation5] sm:$0xff] }
  0xbe   :  { %v308_v61 = vmax.f32 %v307_v60, 1.0 }
  0xc0   :  { %311 = vperm.xlu1 %384, %v308_v61  }
  0xf6   :  { %v163_v62 = vpop.f32.mrb[0].mxu0 }
  0xf7   :  { %v281_v63 = vpop.f32.mrb[0].mxu1  ;;  %v165_v0 = vpop.f32.mrb[1].mxu0 }
  0xf8   :  { %v283_v1 = vpop.f32.mrb[1].mxu1 }
 0x13b   :  { %v300_v2 = vpop.permute.xlu1 %299 }
 0x13c   :  { %386 = vrcp.f32 %v300_v2 }
 0x13f   :  { %v312_v3 = vpop.permute.xlu1 %311 }
 0x140   :  { %388 = vrcp.f32 %v312_v3 }
 0x146   :  { %v387_v6 = vpop.eup %386 }
 0x147   :  { %v303_v7 = vmul.f32 %v387_v6, %v163_v62  ;;  %v304_v9 = vmul.f32 %v387_v6, %v165_v0 }
 0x149   :  { %v321_v13 = vmul.f32 0.3, %v303_v7  ;;  %v322_v14 = vmul.f32 0.3, %v304_v9 }
 0x14a   :  { %v389_v15 = vpop.eup %388 }
 0x14b   :  { %v323_v18 = vadd.f32 %v321_v13, %v319_v8  ;;  %v324_v19 = vadd.f32 %v322_v14, %v320_v10  ;;  %v315_v20 = vmul.f32 %v389_v15, %v281_v63  ;;  %v316_v21 = vmul.f32 %v389_v15, %v283_v1 }
 0x14d   :  { %333 = vst [vmem:[%s535_s7] sm:$0xff] %v323_v18  ;;  %334 = vst [vmem:[%s535_s7 + $0x8] sm:$0xff] %v324_v19  ;;  %v329_v22 = vmul.f32 0.3, %v315_v20  ;;  %v330_v23 = vmul.f32 0.3, %v316_v21 }
 0x14f   :  { %v331_v24 = vadd.f32 %v329_v22, %v327_v16  ;;  %v332_v25 = vadd.f32 %v330_v23, %v328_v17 }
 0x151   :  { %335 = vst [vmem:[%s536_s8] sm:$0xff] %v331_v24  ;;  %336 = vst [vmem:[%s536_s8 + $0x8] sm:$0xff] %v332_v25  ;;  %v337_v26 = vsub.f32 %v323_v18, %v331_v24  ;;  %v338_v27 = vsub.f32 %v324_v19, %v332_v25  ;;  %s390_s8 = scalar_lea.hbm %s534_s6, 16 }
 0x152   :  { %p391_p0 = scmp.ne.s32.totalorder %s534_s6, %s390_s8  ;;  %p394_p1 = scmp.lt.u32.totalorder %s390_s8, %s534_s6 }
 0x153   :  { %v339_v28 = vmul.f32 %v337_v26, %v337_v26  ;;  %v340_v29 = vmul.f32 %v338_v27, %v338_v27 }
 0x154   :  { %p396_p2 = pnand %p394_p1, %p391_p0 }
 0x155   :  { %v341_v30 = vadd.f32 %v340_v29, %v339_v28 }
 0x157   :  { %342 = vadd.xlane.f32.xlu0 %v341_v30 }
 0x1e4   :  { %v343_v31 = vpop.xlane.xlu0 %342 }
 0x1e5   :  { %v344_v32 = vrot.slane %v343_v31, 4 }
 0x1e7   :  { %v345_v33 = vadd.f32 %v344_v32, %v343_v31 }
 0x1e9   :  { %v346_v34 = vrot.slane %v345_v33, 2 }
 0x1eb   :  { %v347_v35 = vadd.f32 %v346_v34, %v345_v33 }
 0x1ed   :  { %v348_v36 = vrot.slane %v347_v35, 1 }
 0x1ef   :  { %v349_v37 = vadd.f32 %v348_v36, %v347_v35 }
 0x1f1   :  { %379 = vpush %v349_v37 }
 0x222   :  { %s380_s7 = spop %379 }
 0x223   :  { %s351_s27 = smul.f32 0.0009765625, %s380_s7 }
 0x225   :  { %353 = sst [smem:[#allocation6]] %s351_s27 }
 0x226   :  { %399 = shalt.err (!%p396_p2)
}
 0x227   :  { %s404_s12 = smov [#allocation6]  }
 0x228   :  { %361 = dma.smem_to_hbm %s404_s12, 16, %s534_s6, [#allocation7]  }
 0x229   :  { %400 = dma.done.wait [#allocation7], 16  }
 0x22a   :  { %401 = vsyncadd [#allocation7], 4294967280 }
 0x22b   :  { %373 = sfence }
 0x22c   :  { %374 = vsyncpa [#allocation7], 1 }

</bundles_post_ra>
